<compile_context>
chip_gen: v5e
topology: v5e:2x2
jax: 0.10.0
libtpu: 0.0.40
codegen_flags: <defaults>
</compile_context>

<pallas_src>
import jax
import jax.numpy as jnp
from jax.experimental import pallas as pl
from jax.experimental.pallas import tpu as pltpu


def mlp_kernel(x_ref, w1_ref, b1_ref, w2_ref, b2_ref, o_ref, acc_ref):
    j = pl.program_id(1)  # hidden-chunk (reduction) axis, last in the grid

    @pl.when(j == 0)
    def _():
        acc_ref[...] = jnp.zeros_like(acc_ref)

    # ---- layer 1 chunk: bf16 operands on the MXU, f32 accumulation ----
    h = jnp.dot(x_ref[...], w1_ref[...], preferred_element_type=jnp.float32)
    h = jnp.maximum(h + b1_ref[...], 0.0)          # (tm, th) f32

    # ---- layer 2 partial: output width is 1, so skip the MXU and do the
    # dot product on the VPU/XLU in f32: acc[i] += sum_j h[i,j] * w2[j] ----
    acc_ref[...] += jnp.sum(h * w2_ref[...], axis=-1, keepdims=True)

    @pl.when(j == pl.num_programs(1) - 1)
    def _():
        # b2 is an SMEM scalar; write the (tm, 1) column directly (no 128-lane
        # broadcast -> no 128x HBM write amplification).
        o_ref[...] = (acc_ref[...] + b2_ref[0, 0]).astype(o_ref.dtype)


def _round_up(n, m):
    return ((n + m - 1) // m) * m


def mlp_forward(x, w1, b1, w2, b2, *, tm=None, th=None, mxu_dtype=jnp.bfloat16):
    """Fused MLP forward: relu(x @ w1 + b1) @ w2 + b2.

    x : (B, inp)
    w1: (inp, hidden), b1: (hidden,) or (1, hidden)
    w2: (hidden, 1),   b2: scalar / (1,) / (1, 1)
    Returns (B, 1) in x.dtype.
    """
    B, inp = x.shape
    hidden = w1.shape[1]
    out_dtype = x.dtype

    # MXU operands in bf16 (f32 accumulation preserved in-kernel); bias and the
    # layer-2 reduction path stay f32.
    x_in = x.astype(mxu_dtype)
    w1_in = jnp.asarray(w1).astype(mxu_dtype)
    b1_in = jnp.asarray(b1, jnp.float32).reshape(1, hidden)
    w2_row = jnp.asarray(w2, jnp.float32).reshape(1, hidden)  # (hidden,1) -> (1,hidden)
    b2_s = jnp.asarray(b2, jnp.float32).reshape(1, 1)          # SMEM scalar

    # ---- VMEM budget (per-generation) ----
    try:
        vmem_cap = getattr(pltpu.get_tpu_info(), "vmem_capacity_bytes",
                           64 * 1024 * 1024)
    except Exception:  # conservative fallback if the query is unavailable
        vmem_cap = 64 * 1024 * 1024
    vmem_budget = int(vmem_cap * 3 // 5)  # ~76 MiB on v5e/v6e, ~38 MiB on v7x

    # ---- hidden-chunk size: must divide hidden exactly (reduction axis) ----
    if th is None:
        if hidden % 128 == 0:
            th = next(t for t in (512, 384, 256, 128) if hidden % t == 0)
        else:
            th = hidden  # small / ragged hidden: single chunk

    # ---- batch tile from the VMEM budget ----
    if tm is None:
        bx = jnp.dtype(mxu_dtype).itemsize
        fixed = 2 * inp * th * bx + 4 * th * 8          # W1 + b1/w2 chunks (dbl-buf)
        per_row = 2 * inp * bx + th * 4 + 4 * 4          # x dbl-buf + h + acc/out
        tm = (vmem_budget // 2 - fixed) // max(per_row, 1)
        tm = max(8, min(int(tm), 1024))
        if B >= 16:
            # keep >= 2 batch tiles so both v7x TensorCores get work
            tm = min(tm, _round_up(-(-B // 2), 8))
        tm = max(8, (tm // 8) * 8)
        tm = min(tm, _round_up(B, 8))

    grid_m = pl.cdiv(B, tm)          # batch: OOB rows masked on write, no pad copy
    grid_h = hidden // th            # reduction axis divides exactly

    return pl.pallas_call(
        mlp_kernel,
        out_shape=jax.ShapeDtypeStruct((B, 1), out_dtype),
        grid_spec=pltpu.PrefetchScalarGridSpec(
            num_scalar_prefetch=0,
            grid=(grid_m, grid_h),
            in_specs=[
                pl.BlockSpec((tm, inp), lambda i, j: (i, 0)),          # x: batch-tiled
                pl.BlockSpec((inp, th), lambda i, j: (0, j)),          # W1 chunk
                pl.BlockSpec((1, th), lambda i, j: (0, j)),            # b1 chunk (f32)
                pl.BlockSpec((1, th), lambda i, j: (0, j)),            # w2 chunk (f32)
                pl.BlockSpec(memory_space=pltpu.MemorySpace.SMEM),     # b2 scalar
            ],
            out_specs=pl.BlockSpec((tm, 1), lambda i, j: (i, 0)),
            scratch_shapes=[pltpu.VMEM((tm, 1), jnp.float32)],         # per-row acc
        ),
        compiler_params=pltpu.CompilerParams(
            dimension_semantics=("parallel", "arbitrary"),
            vmem_limit_bytes=vmem_budget,
        ),
    )(x_in, w1_in, b1_in, w2_row, b2_s)


if __name__ == "__main__":
    hidden_size = 4
    inp_size = 4
    batch = 8

    key = jax.random.PRNGKey(0)
    kx, kw1, kb1, kw2, kb2 = jax.random.split(key, 5)

    # Deterministic parameter init (nn.Linear-equivalent shapes, stored (in, out)).
    x = jax.random.normal(kx, (batch, inp_size), dtype=jnp.float32)
    w1 = jax.random.normal(kw1, (inp_size, hidden_size), dtype=jnp.float32) * 0.5
    b1 = jax.random.normal(kb1, (hidden_size,), dtype=jnp.float32) * 0.1
    w2 = jax.random.normal(kw2, (hidden_size, 1), dtype=jnp.float32) * 0.5
    b2 = jax.random.normal(kb2, (1,), dtype=jnp.float32) * 0.1

    out = mlp_forward(x, w1, b1, w2, b2)
    out = jax.block_until_ready(out)

    # Pure-f32 JAX reference; kernel uses bf16 MXU operands, so tolerance is
    # loosened to ~1e-2-level relative error (per review).
    ref = jnp.maximum(x @ w1 + b1[None, :], 0.0) @ w2 + b2.reshape(1, 1)
    assert out.shape == (batch, 1), out.shape
    assert jnp.allclose(out, ref, atol=5e-2, rtol=5e-2), "mismatch vs reference"

    print("KERNEL_OK")
</pallas_src>

<mosaic_0001>
module attributes {stable_mosaic.version = 11 : i64} {
  func.func @mlp_kernel(%arg0: i32, %arg1: i32, %arg2: memref<8x4xbf16, #tpu.memory_space<vmem>>, %arg3: memref<4x4xbf16, #tpu.memory_space<vmem>>, %arg4: memref<1x4xf32, #tpu.memory_space<vmem>>, %arg5: memref<1x4xf32, #tpu.memory_space<vmem>>, %arg6: memref<1x1xf32, #tpu.memory_space<smem>>, %arg7: memref<8x1xf32, #tpu.memory_space<vmem>>, %arg8: memref<8x1xf32, #tpu.memory_space<vmem>>) attributes {dimension_semantics = [#tpu.dimension_semantics<parallel>, #tpu.dimension_semantics<arbitrary>], iteration_bounds = array<i64: 1, 1>, scalar_prefetch = 0 : i64, scratch_operands = 1 : i64, tpu.core_type = #tpu.core_type<tc>, window_params = [{transform_indices = @transform_0, window_bounds = array<i64: 8, 4>}, {transform_indices = @transform_1, window_bounds = array<i64: 4, 4>}, {transform_indices = @transform_2, window_bounds = array<i64: 1, 4>}, {transform_indices = @transform_3, window_bounds = array<i64: 1, 4>}, {transform_indices = @transform_4, window_bounds = array<i64: 1, 1>}, {transform_indices = @transform_5, window_bounds = array<i64: 8, 1>}]} {
    %c0_i32 = arith.constant 0 : i32
    %0 = arith.cmpi eq, %arg1, %c0_i32 : i32
    %1 = arith.extui %0 : i1 to i32
    %c0_i32_0 = arith.constant 0 : i32
    %2 = arith.cmpi ne, %1, %c0_i32_0 : i32
    scf.if %2 {
      %cst_16 = arith.constant 0.000000e+00 : f32
      %22 = vector.broadcast %cst_16 : f32 to vector<8x1xf32>
      %c0_17 = arith.constant 0 : index
      %c0_18 = arith.constant 0 : index
      %23 = vector.load %arg8[%c0_17, %c0_18] : memref<8x1xf32, #tpu.memory_space<vmem>>, vector<8x1xf32>
      tpu.vector_store %arg8[%c0_17, %c0_18], %22 {strides = array<i32>} : memref<8x1xf32, #tpu.memory_space<vmem>>, vector<8x1xf32>,
    } else {
    }
    %c0 = arith.constant 0 : index
    %c0_1 = arith.constant 0 : index
    %3 = vector.load %arg2[%c0, %c0_1] : memref<8x4xbf16, #tpu.memory_space<vmem>>, vector<8x4xbf16>
    %c0_2 = arith.constant 0 : index
    %c0_3 = arith.constant 0 : index
    %4 = vector.load %arg3[%c0_2, %c0_3] : memref<4x4xbf16, #tpu.memory_space<vmem>>, vector<4x4xbf16>
    %cst = arith.constant dense<0.000000e+00> : vector<8x4xf32>
    %5 = tpu.matmul %3, %4, %cst {dimension_numbers = #tpu.dot_dimension_numbers<[1], [0], [0], [1], [0, 0, 1, 1], [], []>} : vector<8x4xbf16>, vector<4x4xbf16>, vector<8x4xf32> -> vector<8x4xf32>
    %c0_4 = arith.constant 0 : index
    %c0_5 = arith.constant 0 : index
    %6 = vector.load %arg4[%c0_4, %c0_5] : memref<1x4xf32, #tpu.memory_space<vmem>>, vector<1x4xf32>
    %7 = vector.broadcast %6 : vector<1x4xf32> to vector<8x4xf32>
    %8 = arith.addf %5, %7 : vector<8x4xf32>
    %cst_6 = arith.constant 0.000000e+00 : f32
    %9 = vector.broadcast %cst_6 : f32 to vector<8x4xf32>
    %10 = arith.maximumf %8, %9 : vector<8x4xf32>
    %c0_7 = arith.constant 0 : index
    %c0_8 = arith.constant 0 : index
    %11 = vector.load %arg8[%c0_7, %c0_8] : memref<8x1xf32, #tpu.memory_space<vmem>>, vector<8x1xf32>
    %c0_9 = arith.constant 0 : index
    %c0_10 = arith.constant 0 : index
    %12 = vector.load %arg5[%c0_9, %c0_10] : memref<1x4xf32, #tpu.memory_space<vmem>>, vector<1x4xf32>
    %13 = vector.broadcast %12 : vector<1x4xf32> to vector<8x4xf32>
    %14 = arith.mulf %10, %13 : vector<8x4xf32>
    %cst_11 = arith.constant dense<0.000000e+00> : vector<8xf32>
    %15 = vector.multi_reduction <add>, %14, %cst_11 [1] : vector<8x4xf32> to vector<8xf32>
    %16 = vector.shape_cast %15 : vector<8xf32> to vector<8x1xf32>
    %17 = arith.addf %11, %16 : vector<8x1xf32>
    %c0_12 = arith.constant 0 : index
    %c0_13 = arith.constant 0 : index
    %18 = vector.load %arg8[%c0_12, %c0_13] : memref<8x1xf32, #tpu.memory_space<vmem>>, vector<8x1xf32>
    tpu.vector_store %arg8[%c0_12, %c0_13], %17 {strides = array<i32>} : memref<8x1xf32, #tpu.memory_space<vmem>>, vector<8x1xf32>,
    %c0_i32_14 = arith.constant 0 : i32
    %19 = arith.cmpi eq, %arg1, %c0_i32_14 : i32
    %20 = arith.extui %19 : i1 to i32
    %c0_i32_15 = arith.constant 0 : i32
    %21 = arith.cmpi ne, %20, %c0_i32_15 : i32
    scf.if %21 {
      %c0_16 = arith.constant 0 : index
      %c0_17 = arith.constant 0 : index
      %22 = vector.load %arg8[%c0_16, %c0_17] : memref<8x1xf32, #tpu.memory_space<vmem>>, vector<8x1xf32>
      %c0_18 = arith.constant 0 : index
      %c0_19 = arith.constant 0 : index
      %23 = memref.load %arg6[%c0_18, %c0_19] : memref<1x1xf32, #tpu.memory_space<smem>>
      %24 = vector.broadcast %23 : f32 to vector<8x1xf32>
      %25 = arith.addf %22, %24 : vector<8x1xf32>
      %c0_20 = arith.constant 0 : index
      %c0_21 = arith.constant 0 : index
      %26 = vector.load %arg7[%c0_20, %c0_21] : memref<8x1xf32, #tpu.memory_space<vmem>>, vector<8x1xf32>
      tpu.vector_store %arg7[%c0_20, %c0_21], %25 {strides = array<i32>} : memref<8x1xf32, #tpu.memory_space<vmem>>, vector<8x1xf32>,
    } else {
    }
    return
  }
  func.func @transform_0(%arg0: i32, %arg1: i32) -> (i32, i32) {
    %c0_i32 = arith.constant 0 : i32
    %c0_i32_0 = arith.constant 0 : i32
    return %arg0, %c0_i32 : i32, i32
  }
  func.func @transform_1(%arg0: i32, %arg1: i32) -> (i32, i32) {
    %c0_i32 = arith.constant 0 : i32
    %c0_i32_0 = arith.constant 0 : i32
    return %c0_i32, %arg1 : i32, i32
  }
  func.func @transform_2(%arg0: i32, %arg1: i32) -> (i32, i32) {
    %c0_i32 = arith.constant 0 : i32
    %c0_i32_0 = arith.constant 0 : i32
    return %c0_i32, %arg1 : i32, i32
  }
  func.func @transform_3(%arg0: i32, %arg1: i32) -> (i32, i32) {
    %c0_i32 = arith.constant 0 : i32
    %c0_i32_0 = arith.constant 0 : i32
    return %c0_i32, %arg1 : i32, i32
  }
  func.func @transform_4(%arg0: i32, %arg1: i32) -> (i32, i32) {
    %c0_i32 = arith.constant 0 : i32
    %c0_i32_0 = arith.constant 0 : i32
    %c0_i32_1 = arith.constant 0 : i32
    return %c0_i32, %c0_i32_0 : i32, i32
  }
  func.func @transform_5(%arg0: i32, %arg1: i32) -> (i32, i32) {
    %c0_i32 = arith.constant 0 : i32
    %c0_i32_0 = arith.constant 0 : i32
    return %arg0, %c0_i32 : i32, i32
  }
}

</mosaic_0001>

<bundles_post_ra>
// kernel: tpu_custom_call.1
= control target key start
LH: loop header
LB: loop body
LE: loop exit
PB: predicated region body
PF: predicated region fallthrough
CT: control target
= control target key end

     0   :  { %vm38_vm0 = vcmask 1041408   ;;  %vm34_vm1 = vcmask 31744   ;;  %vm26_vm2 = vcmask 7168   ;;  %v84_v3 = vmov 0.0   ;;  %s136_s1 = inlined_call_operand.vmem [shape: bf16[4,4], index: 1, kind: input, shape index: {}]   ;;  %s137_s0 = inlined_call_operand.vmem [shape: bf16[8,4], index: 0, kind: input, shape index: {}]   ;;  %s138_s2 = inlined_call_operand.vmem [shape: f32[1,4], index: 2, kind: input, shape index: {}]   ;;  %s139_s3 = inlined_call_operand.vmem [shape: f32[1,4], index: 3, kind: input, shape index: {}]   ;;  %s140_s4 = inlined_call_operand.<no memory space> [shape: f32[1,1], index: 4, kind: input, shape index: {}]   ;;  %s141_s5 = inlined_call_operand.vmem [shape: f32[8,1], index: 5, kind: output, shape index: {}]  }
   0x1   :  { %v29_v0 = vld [vmem:[%s136_s1] sm:$0x3]  ;;  %27 = vst.msk [vmem:[#allocation2] sm:$0xff] %vm26_vm2, %v84_v3  ;;  %v73_v15 = vstv %s140_s4 }
   0x2   :  { %v40_v1 = vsel %vm38_vm0, %v29_v0, 0  ;;  %v28_v2 = vld [vmem:[%s137_s0] sm:$0xf] }
   0x3   :  { %49 = vmatpush.bf16.msra.mxu0 %v40_v1  ;;  %v82_v4 = vld [vmem:[%s138_s2] ss:$0 sm:$0xff] }
   0x4   :  { %v83_v7 = vld [vmem:[%s139_s3] ss:$0 sm:$0xff] }
   0x6   :  { %80 = vmatmul.msk.bf16.vlgmr.msra.gmra.mxu0 %vm34_vm1, %v28_v2 }
   0x8   :  { %v56_v12 = vld [vmem:[#allocation2] sm:$0xff] }
  0x83   :  { %v51_v5 = vpop.f32.mrf.mxu0 }
  0x84   :  { %v52_v6 = vadd.f32 %v82_v4, %v51_v5 }
  0x86   :  { %v55_v8 = vmax.f32 %v52_v6, 0.0 }
  0x88   :  { %v61_v9 = vmul.f32 %v83_v7, %v55_v8 }
  0x8a   :  { %v62_v10 = vsel %vm34_vm1, %v61_v9, 0.0 }
  0x8b   :  { %v53_v11 = vpop.f32.mrf.mxu0  ;;  %63 = vadd.xlane.f32.xlu0 %v62_v10 }
  0xfe   :  { %v64_v13 = vpop.xlane.xlu0 %63 }
  0xff   :  { %v65_v14 = vadd.f32 %v64_v13, %v56_v12 }
 0x101   :  { %67 = vst.msk [vmem:[#allocation2] sm:$0xff] %vm26_vm2, %v65_v14 }
 0x108   :  { %v71_v16 = vld [vmem:[#allocation2] sm:$0xff] }
 0x109   :  { %v74_v17 = vadd.f32 %v73_v15, %v71_v16 }
 0x10b   :  { %75 = vst.msk [vmem:[%s141_s5] sm:$0xff] %vm26_vm2, %v74_v17 }

</bundles_post_ra>
